<compile_context>
chip_gen: v5e
topology: v5e:2x2
jax: 0.10.0
libtpu: 0.0.40
codegen_flags: <defaults>
</compile_context>

<pallas_src>
import jax
import jax.numpy as jnp
from jax.experimental import pallas as pl
from jax.experimental.pallas import tpu as pltpu


# ---------------------------------------------------------------------------
# Pallas kernel: one MXU matmul per batch tile (+ broadcast bias row).
#   m_ref    : (HWp, HWp)  composed dense operator (VMEM-resident, constant)
#   bias_ref : (1,  HWp)   composed bias row (constant)
#   x_ref    : (TB, HWp)   batch tile, rows on sublanes, pixels on lanes
#   o_ref    : (TB, HWp)
# ---------------------------------------------------------------------------
def _ae_matmul_kernel(m_ref, bias_ref, x_ref, o_ref):
    o_ref[...] = (
        jnp.dot(x_ref[...], m_ref[...], preferred_element_type=jnp.float32)
        + bias_ref[...]
    )


# ---------------------------------------------------------------------------
# Layer-by-layer lax implementation of the PyTorch module (NCHW). Used both as
# the validation reference and (on the tiny pixel basis) to build the exact
# composed operator for the kernel.
# ---------------------------------------------------------------------------
def _apply_layers(h, params, *, zero_bias=False):
    dn = ("NCHW", "OIHW", "NCHW")
    prec = jax.lax.Precision.HIGHEST

    def b_(b):
        return jnp.zeros_like(b) if zero_bias else b

    def conv(h, w, b):
        y = jax.lax.conv_general_dilated(h, w, (1, 1), "VALID",
                                         dimension_numbers=dn, precision=prec)
        return y + b_(b)[None, :, None, None]

    def conv_t(h, w, b):  # w: (Cin, Cout, 2, 2), stride-1 transposed conv
        w_eff = jnp.flip(w, axis=(2, 3)).transpose(1, 0, 2, 3)
        y = jax.lax.conv_general_dilated(h, w_eff, (1, 1), [(1, 1), (1, 1)],
                                         dimension_numbers=dn, precision=prec)
        return y + b_(b)[None, :, None, None]

    h = conv(h, params["w1"], params["b1"])
    h = conv(h, params["w2"], params["b2"])
    h = conv_t(h, params["w2t"], params["b2t"])
    h = conv_t(h, params["w1t"], params["b1t"])
    return h


def _compose_dense_operator(params, H, W):
    """Exact (H*W, H*W) linear operator + (1, H*W) bias of the affine net."""
    HW = H * W
    basis = jnp.eye(HW, dtype=jnp.float32).reshape(HW, 1, H, W)
    m = _apply_layers(basis, params, zero_bias=True).reshape(HW, HW)
    bias = _apply_layers(jnp.zeros((1, 1, H, W), jnp.float32), params)
    return m, bias.reshape(1, HW)


# ---------------------------------------------------------------------------
# Wrapper: compose operator, choose batch tiling, launch the Pallas grid.
# ---------------------------------------------------------------------------
def autoencoder_forward(x, params):
    """x: (H, W) or (B, H, W) float32; returns the same leading shape."""
    squeeze = x.ndim == 2
    if squeeze:
        x = x[None]
    x = x.astype(jnp.float32)
    B, H, W = x.shape
    HW = H * W

    # TODO(synk): add a row-tiled (2-row halo) two-stage conv path for large
    # spatial sizes; the dense-operator path needs (HW, HW) resident in VMEM.
    assert HW * HW * 4 <= (8 << 20), "dense-operator path expects <= ~38x38 spatial"

    m, bias = _compose_dense_operator(params, H, W)

    # Pad the pixel axis to a lane multiple so MXU tiles and stores are dense.
    HWp = -(-HW // 128) * 128
    if HWp != HW:
        m = jnp.zeros((HWp, HWp), jnp.float32).at[:HW, :HW].set(m)
        bias = jnp.zeros((1, HWp), jnp.float32).at[:, :HW].set(bias)

    # Batch tile: rows on sublanes (multiple of 8). Aim for >=2 grid steps so
    # both v7x TensorCores get work; cap at 512 rows to amortize per-step cost.
    B8 = -(-B // 8) * 8
    if B8 <= 16:
        TB = B8
    else:
        TB = min(512, 8 * (-(-B8 // 16)))
    Bp = -(-B8 // TB) * TB
    grid = Bp // TB

    x_flat = x.reshape(B, HW)
    if Bp != B or HWp != HW:
        x_flat = jnp.zeros((Bp, HWp), jnp.float32).at[:B, :HW].set(x_flat)

    # Explicit VMEM budget: double-buffered in/out tiles + resident operator.
    vmem_need = 4 * (4 * TB * HWp + HWp * HWp + HWp)
    vmem_limit = int(min(max(2 * vmem_need, 32 << 20), 110 << 20))

    out = pl.pallas_call(
        _ae_matmul_kernel,
        out_shape=jax.ShapeDtypeStruct((Bp, HWp), jnp.float32),
        grid=(grid,),
        in_specs=[
            pl.BlockSpec((HWp, HWp), lambda b: (0, 0)),   # operator (constant)
            pl.BlockSpec((1, HWp), lambda b: (0, 0)),     # bias row (constant)
            pl.BlockSpec((TB, HWp), lambda b: (b, 0)),    # batch tile
        ],
        out_specs=pl.BlockSpec((TB, HWp), lambda b: (b, 0)),
        compiler_params=pltpu.CompilerParams(
            dimension_semantics=("parallel",),            # 2 TCs on v7x
            vmem_limit_bytes=vmem_limit,
        ),
        cost_estimate=pl.CostEstimate(
            flops=2 * Bp * HWp * HWp,
            transcendentals=0,
            bytes_accessed=4 * (2 * Bp * HWp + HWp * HWp + HWp),
        ),
    )(m, bias, x_flat)

    out = out[:B, :HW].reshape(B, H, W)
    return out[0] if squeeze else out


# ---------------------------------------------------------------------------
# Reference (layer-by-layer, PyTorch semantics) for validation.
# ---------------------------------------------------------------------------
def reference_forward(x_bhw, params):
    return _apply_layers(x_bhw[:, None, :, :], params)[:, 0]


def init_params(key):
    """Deterministic init mimicking PyTorch default uniform(-1/sqrt(fan_in), .)."""
    ks = jax.random.split(key, 8)

    def u(k, shape, fan_in):
        bound = 1.0 / jnp.sqrt(jnp.float32(fan_in))
        return jax.random.uniform(k, shape, jnp.float32, -bound, bound)

    return {
        "w1": u(ks[0], (3, 1, 2, 2), 1 * 4), "b1": u(ks[1], (3,), 1 * 4),
        "w2": u(ks[2], (4, 3, 2, 2), 3 * 4), "b2": u(ks[3], (4,), 3 * 4),
        "w2t": u(ks[4], (4, 3, 2, 2), 4 * 4), "b2t": u(ks[5], (3,), 4 * 4),
        "w1t": u(ks[6], (3, 1, 2, 2), 3 * 4), "b1t": u(ks[7], (1,), 3 * 4),
    }


if __name__ == "__main__":
    key = jax.random.PRNGKey(0)
    kx, kp = jax.random.split(key)

    B, H, W = 256, 16, 16
    x = jax.random.normal(kx, (B, H, W), dtype=jnp.float32)
    params = init_params(kp)

    fwd = jax.jit(autoencoder_forward)
    out = jax.block_until_ready(fwd(x, params))
    ref = jax.block_until_ready(reference_forward(x, params))

    assert out.shape == (B, H, W)
    if not jnp.allclose(out, ref, atol=1e-4, rtol=1e-4):
        raise AssertionError("Pallas kernel output mismatch vs JAX reference (batched)")

    # Single-image path, matching the original module's (H, W) -> (H, W) semantics.
    out1 = jax.block_until_ready(autoencoder_forward(x[0], params))
    if not (out1.shape == (H, W) and jnp.allclose(out1, ref[0], atol=1e-4, rtol=1e-4)):
        raise AssertionError("Pallas kernel output mismatch vs JAX reference (single image)")

    print("KERNEL_OK")
</pallas_src>

<mosaic_0001>
module attributes {stable_mosaic.version = 11 : i64} {
  func.func @_ae_matmul_kernel(%arg0: i32, %arg1: memref<256x256xf32, #tpu.memory_space<vmem>>, %arg2: memref<1x256xf32, #tpu.memory_space<vmem>>, %arg3: memref<128x256xf32, #tpu.memory_space<vmem>>, %arg4: memref<128x256xf32, #tpu.memory_space<vmem>>) attributes {dimension_semantics = [#tpu.dimension_semantics<parallel>], iteration_bounds = array<i64: 2>, scalar_prefetch = 0 : i64, scratch_operands = 0 : i64, tpu.core_type = #tpu.core_type<tc>, window_params = [{pipeline_mode = #tpu.pipeline_mode<synchronous>, transform_indices = @transform_0, window_bounds = array<i64: 256, 256>}, {pipeline_mode = #tpu.pipeline_mode<synchronous>, transform_indices = @transform_1, window_bounds = array<i64: 1, 256>}, {transform_indices = @transform_2, window_bounds = array<i64: 128, 256>}, {transform_indices = @transform_3, window_bounds = array<i64: 128, 256>}]} {
    %c0 = arith.constant 0 : index
    %c0_0 = arith.constant 0 : index
    %0 = vector.load %arg3[%c0, %c0_0] : memref<128x256xf32, #tpu.memory_space<vmem>>, vector<128x256xf32>
    %c0_1 = arith.constant 0 : index
    %c0_2 = arith.constant 0 : index
    %1 = vector.load %arg1[%c0_1, %c0_2] : memref<256x256xf32, #tpu.memory_space<vmem>>, vector<256x256xf32>
    %cst = arith.constant dense<0.000000e+00> : vector<128x256xf32>
    %2 = tpu.matmul %0, %1, %cst {dimension_numbers = #tpu.dot_dimension_numbers<[1], [0], [0], [1], [0, 0, 1, 1], [], []>} : vector<128x256xf32>, vector<256x256xf32>, vector<128x256xf32> -> vector<128x256xf32>
    %c0_3 = arith.constant 0 : index
    %c0_4 = arith.constant 0 : index
    %3 = vector.load %arg2[%c0_3, %c0_4] : memref<1x256xf32, #tpu.memory_space<vmem>>, vector<1x256xf32>
    %4 = vector.broadcast %3 : vector<1x256xf32> to vector<128x256xf32>
    %5 = arith.addf %2, %4 : vector<128x256xf32>
    %c0_5 = arith.constant 0 : index
    %c0_6 = arith.constant 0 : index
    %6 = vector.load %arg4[%c0_5, %c0_6] : memref<128x256xf32, #tpu.memory_space<vmem>>, vector<128x256xf32>
    tpu.vector_store %arg4[%c0_5, %c0_6], %5 {strides = array<i32>} : memref<128x256xf32, #tpu.memory_space<vmem>>, vector<128x256xf32>,
    return
  }
  func.func @transform_0(%arg0: i32) -> (i32, i32) {
    %c0_i32 = arith.constant 0 : i32
    %c0_i32_0 = arith.constant 0 : i32
    %c0_i32_1 = arith.constant 0 : i32
    return %c0_i32, %c0_i32_0 : i32, i32
  }
  func.func @transform_1(%arg0: i32) -> (i32, i32) {
    %c0_i32 = arith.constant 0 : i32
    %c0_i32_0 = arith.constant 0 : i32
    %c0_i32_1 = arith.constant 0 : i32
    return %c0_i32, %c0_i32_0 : i32, i32
  }
  func.func @transform_2(%arg0: i32) -> (i32, i32) {
    %c0_i32 = arith.constant 0 : i32
    %c0_i32_0 = arith.constant 0 : i32
    return %arg0, %c0_i32 : i32, i32
  }
  func.func @transform_3(%arg0: i32) -> (i32, i32) {
    %c0_i32 = arith.constant 0 : i32
    %c0_i32_0 = arith.constant 0 : i32
    return %arg0, %c0_i32 : i32, i32
  }
}

</mosaic_0001>

<bundles_post_ra>
// kernel: autoencoder_forward.1
= control target key start
LH: loop header
LB: loop body
LE: loop exit
PB: predicated region body
PF: predicated region fallthrough
CT: control target
= control target key end

     0   :  { %s682_s12 = smov 0   ;;  %s1013_s0 = inlined_call_operand.vmem [shape: f32[256,256], index: 0, kind: input, shape index: {}]   ;;  %s1014_s1 = inlined_call_operand.vmem [shape: f32[1,256], index: 1, kind: input, shape index: {}]   ;;  %s1015_s2 = inlined_call_operand.vmem [shape: f32[256,256], index: 2, kind: input, shape index: {}]   ;;  %s1016_s3 = inlined_call_operand.vmem [shape: f32[256,256], index: 3, kind: output, shape index: {}]  }
   0x1 LB: > { %s631_s13 = sadd.s32 4294967295, %s660_s12   ;;  %p635_p0 = scmp.ge.s32.totalorder %s660_s12, 1  ;;  %s660_s12 = sphi %s682_s12, %s13_s12  }
   0x2   : > { %p139_p1 = scmp.lt.s32.totalorder %s660_s12, 3 }
   0x4   : > { %p140_p2 = pnand %p635_p0, %p139_p1 }
   0x5   : > { %s779_s22 = sshll.u32 (!%p140_p2), %s631_s13, 4 }
   0x6   : > { %143 = sbr.rel (%p140_p2) target bundleno = 300 (0x12c), region = 32  ;;  %p166_p3 = scmp.lt.s32.totalorder (!%p140_p2), %s779_s22, 31 }
   0xb   : > { %v242_v0 = vld [vmem:[%s1013_s0 + $0xf8] sm:$0xff]  ;;  %v240_v1 = vld [vmem:[%s1013_s0 + $0xe8] sm:$0xff]  ;;  %v241_v4 = vld [vmem:[%s1013_s0 + $0xf0] sm:$0xff]  ;;  %s1018_s22 = smov (!%p166_p3, %s779_s22), 31 }
   0xc   : > { %v274_v2 = vld [vmem:[%s1013_s0 + $0x1f8] sm:$0xff]  ;;  %411 = vmatpush.msra.mxu2 %v242_v0  ;;  %v272_v3 = vld [vmem:[%s1013_s0 + $0x1e8] sm:$0xff]  ;;  %281 = vmatpush.msra.mxu0 %v241_v4  ;;  %v239_v7 = vld [vmem:[%s1013_s0 + $0xe0] sm:$0xff]  ;;  %s644_s16 = sshll.u32 %s1018_s22, 4 }
   0xd   : > { %476 = vmatpush.msra.mxu3 %v274_v2  ;;  %v238_v5 = vld [vmem:[%s1013_s0 + $0xd8] sm:$0xff]  ;;  %v236_v8 = vld [vmem:[%s1013_s0 + $0xc8] sm:$0xff]  ;;  %v273_v9 = vld [vmem:[%s1013_s0 + $0x1f0] sm:$0xff]  ;;  %s877_s4 = scalar_lea.vmem %s1015_s2, %s644_s16  ;;  %s945_s27 = scalar_lea.vmem %s1016_s3, %s644_s16 }
   0xe   : > { %v270_v6 = vld [vmem:[%s1013_s0 + $0x1d8] sm:$0xff]  ;;  %412 = vmatpush.msra.mxu2 %v240_v1  ;;  %282 = vmatpush.msra.mxu0 %v239_v7  ;;  %v268_v10 = vld [vmem:[%s1013_s0 + $0x1c8] sm:$0xff]  ;;  %v237_v11 = vld [vmem:[%s1013_s0 + $0xd0] sm:$0xff] }
   0xf   : > { %477 = vmatpush.msra.mxu3 %v272_v3  ;;  %346 = vmatpush.msra.mxu1 %v273_v9  ;;  %v271_v12 = vld [vmem:[%s1013_s0 + $0x1e0] sm:$0xff]  ;;  %v269_v14 = vld [vmem:[%s1013_s0 + $0x1d0] sm:$0xff]  ;;  %v234_v15 = vld [vmem:[%s1013_s0 + $0xb8] sm:$0xff] }
  0x10   : > { %413 = vmatpush.msra.mxu2 %v238_v5  ;;  %v235_v13 = vld [vmem:[%s1013_s0 + $0xc0] sm:$0xff]  ;;  %283 = vmatpush.msra.mxu0 %v237_v11  ;;  %v266_v16 = vld [vmem:[%s1013_s0 + $0x1b8] sm:$0xff]  ;;  %v233_v17 = vld [vmem:[%s1013_s0 + $0xb0] sm:$0xff] }
  0x11   : > { %478 = vmatpush.msra.mxu3 %v270_v6  ;;  %347 = vmatpush.msra.mxu1 %v271_v12  ;;  %v267_v18 = vld [vmem:[%s1013_s0 + $0x1c0] sm:$0xff]  ;;  %v232_v19 = vld [vmem:[%s1013_s0 + $0xa8] sm:$0xff]  ;;  %v265_v22 = vld [vmem:[%s1013_s0 + $0x1b0] sm:$0xff] }
  0x12   : > { %414 = vmatpush.msra.mxu2 %v236_v8  ;;  %284 = vmatpush.msra.mxu0 %v235_v13  ;;  %v264_v20 = vld [vmem:[%s1013_s0 + $0x1a8] sm:$0xff]  ;;  %v231_v21 = vld [vmem:[%s1013_s0 + $0xa0] sm:$0xff]  ;;  %v230_v23 = vld [vmem:[%s1013_s0 + $0x98] sm:$0xff] }
  0x13   : > { %479 = vmatpush.msra.mxu3 %v268_v10  ;;  %348 = vmatpush.msra.mxu1 %v269_v14  ;;  %v262_v24 = vld [vmem:[%s1013_s0 + $0x198] sm:$0xff]  ;;  %v229_v25 = vld [vmem:[%s1013_s0 + $0x90] sm:$0xff]  ;;  %v263_v26 = vld [vmem:[%s1013_s0 + $0x1a0] sm:$0xff] }
  0x14   : > { %415 = vmatpush.msra.mxu2 %v234_v15  ;;  %285 = vmatpush.msra.mxu0 %v233_v17  ;;  %v228_v27 = vld [vmem:[%s1013_s0 + $0x88] sm:$0xff]  ;;  %v227_v29 = vld [vmem:[%s1013_s0 + $0x80] sm:$0xff]  ;;  %v261_v30 = vld [vmem:[%s1013_s0 + $0x190] sm:$0xff] }
  0x15   : > { %480 = vmatpush.msra.mxu3 %v266_v16  ;;  %349 = vmatpush.msra.mxu1 %v267_v18  ;;  %v260_v28 = vld [vmem:[%s1013_s0 + $0x188] sm:$0xff]  ;;  %v226_v31 = vld [vmem:[%s1013_s0 + $0x78] sm:$0xff]  ;;  %v225_v33 = vld [vmem:[%s1013_s0 + $0x70] sm:$0xff] }
  0x16   : > { %416 = vmatpush.msra.mxu2 %v232_v19  ;;  %286 = vmatpush.msra.mxu0 %v231_v21  ;;  %v258_v32 = vld [vmem:[%s1013_s0 + $0x178] sm:$0xff]  ;;  %v259_v34 = vld [vmem:[%s1013_s0 + $0x180] sm:$0xff]  ;;  %v224_v35 = vld [vmem:[%s1013_s0 + $0x68] sm:$0xff] }
  0x17   : > { %481 = vmatpush.msra.mxu3 %v264_v20  ;;  %350 = vmatpush.msra.mxu1 %v265_v22  ;;  %v256_v36 = vld [vmem:[%s1013_s0 + $0x168] sm:$0xff]  ;;  %v223_v37 = vld [vmem:[%s1013_s0 + $0x60] sm:$0xff]  ;;  %v257_v38 = vld [vmem:[%s1013_s0 + $0x170] sm:$0xff] }
  0x18   : > { %417 = vmatpush.msra.mxu2 %v230_v23  ;;  %287 = vmatpush.msra.mxu0 %v229_v25  ;;  %v222_v39 = vld [vmem:[%s1013_s0 + $0x58] sm:$0xff]  ;;  %v221_v41 = vld [vmem:[%s1013_s0 + $0x50] sm:$0xff]  ;;  %v255_v42 = vld [vmem:[%s1013_s0 + $0x160] sm:$0xff] }
  0x19   : > { %482 = vmatpush.msra.mxu3 %v262_v24  ;;  %351 = vmatpush.msra.mxu1 %v263_v26  ;;  %v254_v40 = vld [vmem:[%s1013_s0 + $0x158] sm:$0xff]  ;;  %v220_v43 = vld [vmem:[%s1013_s0 + $0x48] sm:$0xff]  ;;  %v219_v45 = vld [vmem:[%s1013_s0 + $0x40] sm:$0xff] }
  0x1a   : > { %418 = vmatpush.msra.mxu2 %v228_v27  ;;  %288 = vmatpush.msra.mxu0 %v227_v29  ;;  %v252_v44 = vld [vmem:[%s1013_s0 + $0x148] sm:$0xff]  ;;  %v253_v46 = vld [vmem:[%s1013_s0 + $0x150] sm:$0xff]  ;;  %v218_v47 = vld [vmem:[%s1013_s0 + $0x38] sm:$0xff] }
  0x1b   : > { %483 = vmatpush.msra.mxu3 %v260_v28  ;;  %352 = vmatpush.msra.mxu1 %v261_v30  ;;  %v250_v48 = vld [vmem:[%s1013_s0 + $0x138] sm:$0xff]  ;;  %v217_v49 = vld [vmem:[%s1013_s0 + $0x30] sm:$0xff]  ;;  %v251_v50 = vld [vmem:[%s1013_s0 + $0x140] sm:$0xff] }
  0x1c   : > { %419 = vmatpush.msra.mxu2 %v226_v31  ;;  %289 = vmatpush.msra.mxu0 %v225_v33  ;;  %v216_v51 = vld [vmem:[%s1013_s0 + $0x28] sm:$0xff]  ;;  %v215_v53 = vld [vmem:[%s1013_s0 + $0x20] sm:$0xff]  ;;  %v249_v54 = vld [vmem:[%s1013_s0 + $0x130] sm:$0xff] }
  0x1d   : > { %484 = vmatpush.msra.mxu3 %v258_v32  ;;  %353 = vmatpush.msra.mxu1 %v259_v34  ;;  %v248_v52 = vld [vmem:[%s1013_s0 + $0x128] sm:$0xff]  ;;  %v214_v55 = vld [vmem:[%s1013_s0 + $0x18] sm:$0xff]  ;;  %v213_v57 = vld [vmem:[%s1013_s0 + $0x10] sm:$0xff] }
  0x1e   : > { %420 = vmatpush.msra.mxu2 %v224_v35  ;;  %290 = vmatpush.msra.mxu0 %v223_v37  ;;  %v246_v56 = vld [vmem:[%s1013_s0 + $0x118] sm:$0xff]  ;;  %v247_v58 = vld [vmem:[%s1013_s0 + $0x120] sm:$0xff]  ;;  %v212_v59 = vld [vmem:[%s1013_s0 + $0x8] sm:$0xff] }
  0x1f   : > { %485 = vmatpush.msra.mxu3 %v256_v36  ;;  %354 = vmatpush.msra.mxu1 %v257_v38  ;;  %v244_v60 = vld [vmem:[%s1013_s0 + $0x108] sm:$0xff]  ;;  %v179_v61 = vld [vmem:[%s877_s4] sm:$0xff]  ;;  %v245_v0 = vld [vmem:[%s1013_s0 + $0x110] sm:$0xff] }
  0x20   : > { %421 = vmatpush.msra.mxu2 %v222_v39  ;;  %291 = vmatpush.msra.mxu0 %v221_v41  ;;  %v180_v62 = vld [vmem:[%s877_s4 + $0x8] sm:$0xff]  ;;  %v211_v63 = vld [vmem:[%s1013_s0] sm:$0xff]  ;;  %v181_v2 = vld [vmem:[%s877_s4 + $0x10] sm:$0xff] }
  0x21   : > { %486 = vmatpush.msra.mxu3 %v254_v40  ;;  %355 = vmatpush.msra.mxu1 %v255_v42  ;;  %v243_v1 = vld [vmem:[%s1013_s0 + $0x100] sm:$0xff]  ;;  %v182_v3 = vld [vmem:[%s877_s4 + $0x18] sm:$0xff]  ;;  %v184_v5 = vld [vmem:[%s877_s4 + $0x28] sm:$0xff] }
  0x22   : > { %422 = vmatpush.msra.mxu2 %v220_v43  ;;  %292 = vmatpush.msra.mxu0 %v219_v45  ;;  %v183_v4 = vld [vmem:[%s877_s4 + $0x20] sm:$0xff]  ;;  %v185_v6 = vld [vmem:[%s877_s4 + $0x30] sm:$0xff]  ;;  %v186_v7 = vld [vmem:[%s877_s4 + $0x38] sm:$0xff] }
  0x23   : > { %487 = vmatpush.msra.mxu3 %v252_v44  ;;  %356 = vmatpush.msra.mxu1 %v253_v46  ;;  %v187_v8 = vld [vmem:[%s877_s4 + $0x40] sm:$0xff]  ;;  %v188_v9 = vld [vmem:[%s877_s4 + $0x48] sm:$0xff]  ;;  %v189_v10 = vld [vmem:[%s877_s4 + $0x50] sm:$0xff] }
  0x24   : > { %423 = vmatpush.msra.mxu2 %v218_v47  ;;  %293 = vmatpush.msra.mxu0 %v217_v49  ;;  %v190_v11 = vld [vmem:[%s877_s4 + $0x58] sm:$0xff]  ;;  %v191_v12 = vld [vmem:[%s877_s4 + $0x60] sm:$0xff]  ;;  %v192_v13 = vld [vmem:[%s877_s4 + $0x68] sm:$0xff] }
  0x25   : > { %488 = vmatpush.msra.mxu3 %v250_v48  ;;  %357 = vmatpush.msra.mxu1 %v251_v50  ;;  %v193_v14 = vld [vmem:[%s877_s4 + $0x70] sm:$0xff]  ;;  %v194_v15 = vld [vmem:[%s877_s4 + $0x78] sm:$0xff]  ;;  %v195_v16 = vld [vmem:[%s877_s4 + $0x80] sm:$0xff] }
  0x26   : > { %424 = vmatpush.msra.mxu2 %v216_v51  ;;  %294 = vmatpush.msra.mxu0 %v215_v53  ;;  %v196_v17 = vld [vmem:[%s877_s4 + $0x88] sm:$0xff]  ;;  %v197_v18 = vld [vmem:[%s877_s4 + $0x90] sm:$0xff]  ;;  %v198_v19 = vld [vmem:[%s877_s4 + $0x98] sm:$0xff] }
  0x27   : > { %489 = vmatpush.msra.mxu3 %v248_v52  ;;  %358 = vmatpush.msra.mxu1 %v249_v54  ;;  %v199_v20 = vld [vmem:[%s877_s4 + $0xa0] sm:$0xff]  ;;  %v200_v21 = vld [vmem:[%s877_s4 + $0xa8] sm:$0xff]  ;;  %v201_v22 = vld [vmem:[%s877_s4 + $0xb0] sm:$0xff] }
  0x28   : > { %425 = vmatpush.msra.mxu2 %v214_v55  ;;  %295 = vmatpush.msra.mxu0 %v213_v57  ;;  %v202_v23 = vld [vmem:[%s877_s4 + $0xb8] sm:$0xff]  ;;  %v203_v24 = vld [vmem:[%s877_s4 + $0xc0] sm:$0xff]  ;;  %v204_v25 = vld [vmem:[%s877_s4 + $0xc8] sm:$0xff] }
  0x29   : > { %490 = vmatpush.msra.mxu3 %v246_v56  ;;  %359 = vmatpush.msra.mxu1 %v247_v58  ;;  %v205_v26 = vld [vmem:[%s877_s4 + $0xd0] sm:$0xff]  ;;  %v206_v27 = vld [vmem:[%s877_s4 + $0xd8] sm:$0xff]  ;;  %v207_v28 = vld [vmem:[%s877_s4 + $0xe0] sm:$0xff] }
  0x2a   : > { %426 = vmatpush.msra.mxu2 %v212_v59  ;;  %296 = vmatpush.msra.mxu0 %v211_v63  ;;  %v208_v29 = vld [vmem:[%s877_s4 + $0xe8] sm:$0xff]  ;;  %v209_v30 = vld [vmem:[%s877_s4 + $0xf0] sm:$0xff]  ;;  %v210_v31 = vld [vmem:[%s877_s4 + $0xf8] sm:$0xff] }
  0x2b   : > { %491 = vmatpush.msra.mxu3 %v244_v60  ;;  %427 = vmatmul.f32.vlgmr.msra.gmra.mxu2 %v179_v61  ;;  %v275_v32 = vld [vmem:[%s1014_s1] sm:$0x3] }
  0x2c   : > { %492 = vmatmul.f32.vlgmr.msra.gmra.mxu3 %v180_v62  ;;  %360 = vmatpush.msra.mxu1 %v245_v0  ;;  %v935_v33 = vperm.slane %v275_v32, 0  ;;  %v938_v36 = vperm.slane %v275_v32, 1 }
  0x2d   : > { %297 = vmatmul.f32.vlgmr.msra.gmra.mxu0 %v179_v61 }
  0x2e   : > { %361 = vmatpush.msra.mxu1 %v243_v1 }
  0x2f   : > { %362 = vmatmul.f32.vlgmr.msra.gmra.mxu1 %v180_v62 }
  0x33   : > { %430 = vmatmul.f32.gmra.mxu2 %v181_v2 }
  0x34   : > { %495 = vmatmul.f32.gmra.mxu3 %v182_v3 }
  0x35   : > { %300 = vmatmul.f32.gmra.mxu0 %v181_v2 }
  0x37   : > { %365 = vmatmul.f32.gmra.mxu1 %v182_v3 }
  0x3b   : > { %433 = vmatmul.f32.gmra.mxu2 %v183_v4 }
  0x3c   : > { %498 = vmatmul.f32.gmra.mxu3 %v184_v5 }
  0x3d   : > { %303 = vmatmul.f32.gmra.mxu0 %v183_v4 }
  0x3f   : > { %368 = vmatmul.f32.gmra.mxu1 %v184_v5 }
  0x43   : > { %436 = vmatmul.f32.gmra.mxu2 %v185_v6 }
  0x44   : > { %501 = vmatmul.f32.gmra.mxu3 %v186_v7 }
  0x45   : > { %306 = vmatmul.f32.gmra.mxu0 %v185_v6 }
  0x47   : > { %371 = vmatmul.f32.gmra.mxu1 %v186_v7 }
  0x4b   : > { %439 = vmatmul.f32.gmra.mxu2 %v187_v8 }
  0x4c   : > { %504 = vmatmul.f32.gmra.mxu3 %v188_v9 }
  0x4d   : > { %309 = vmatmul.f32.gmra.mxu0 %v187_v8 }
  0x4f   : > { %374 = vmatmul.f32.gmra.mxu1 %v188_v9 }
  0x53   : > { %442 = vmatmul.f32.gmra.mxu2 %v189_v10 }
  0x54   : > { %507 = vmatmul.f32.gmra.mxu3 %v190_v11 }
  0x55   : > { %312 = vmatmul.f32.gmra.mxu0 %v189_v10 }
  0x57   : > { %377 = vmatmul.f32.gmra.mxu1 %v190_v11 }
  0x5b   : > { %445 = vmatmul.f32.gmra.mxu2 %v191_v12 }
  0x5c   : > { %510 = vmatmul.f32.gmra.mxu3 %v192_v13 }
  0x5d   : > { %315 = vmatmul.f32.gmra.mxu0 %v191_v12 }
  0x5f   : > { %380 = vmatmul.f32.gmra.mxu1 %v192_v13 }
  0x63   : > { %448 = vmatmul.f32.gmra.mxu2 %v193_v14 }
  0x64   : > { %513 = vmatmul.f32.gmra.mxu3 %v194_v15 }
  0x65   : > { %318 = vmatmul.f32.gmra.mxu0 %v193_v14 }
  0x67   : > { %383 = vmatmul.f32.gmra.mxu1 %v194_v15 }
  0x6b   : > { %451 = vmatmul.f32.gmra.mxu2 %v195_v16 }
  0x6c   : > { %516 = vmatmul.f32.gmra.mxu3 %v196_v17 }
  0x6d   : > { %321 = vmatmul.f32.gmra.mxu0 %v195_v16 }
  0x6f   : > { %386 = vmatmul.f32.gmra.mxu1 %v196_v17 }
  0x73   : > { %454 = vmatmul.f32.gmra.mxu2 %v197_v18 }
  0x74   : > { %519 = vmatmul.f32.gmra.mxu3 %v198_v19 }
  0x75   : > { %324 = vmatmul.f32.gmra.mxu0 %v197_v18 }
  0x77   : > { %389 = vmatmul.f32.gmra.mxu1 %v198_v19 }
  0x7b   : > { %457 = vmatmul.f32.gmra.mxu2 %v199_v20 }
  0x7c   : > { %522 = vmatmul.f32.gmra.mxu3 %v200_v21 }
  0x7d   : > { %327 = vmatmul.f32.gmra.mxu0 %v199_v20 }
  0x7f   : > { %392 = vmatmul.f32.gmra.mxu1 %v200_v21 }
  0x83   : > { %460 = vmatmul.f32.gmra.mxu2 %v201_v22 }
  0x84   : > { %525 = vmatmul.f32.gmra.mxu3 %v202_v23 }
  0x85   : > { %330 = vmatmul.f32.gmra.mxu0 %v201_v22 }
  0x87   : > { %395 = vmatmul.f32.gmra.mxu1 %v202_v23 }
  0x8b   : > { %463 = vmatmul.f32.gmra.mxu2 %v203_v24 }
  0x8c   : > { %528 = vmatmul.f32.gmra.mxu3 %v204_v25 }
  0x8d   : > { %333 = vmatmul.f32.gmra.mxu0 %v203_v24 }
  0x8f   : > { %398 = vmatmul.f32.gmra.mxu1 %v204_v25 }
  0x93   : > { %466 = vmatmul.f32.gmra.mxu2 %v205_v26 }
  0x94   : > { %531 = vmatmul.f32.gmra.mxu3 %v206_v27 }
  0x95   : > { %336 = vmatmul.f32.gmra.mxu0 %v205_v26 }
  0x97   : > { %401 = vmatmul.f32.gmra.mxu1 %v206_v27 }
  0x9b   : > { %469 = vmatmul.f32.gmra.mxu2 %v207_v28 }
  0x9c   : > { %534 = vmatmul.f32.gmra.mxu3 %v208_v29 }
  0x9d   : > { %339 = vmatmul.f32.gmra.mxu0 %v207_v28 }
  0x9f   : > { %404 = vmatmul.f32.gmra.mxu1 %v208_v29 }
  0xa3   : > { %472 = vmatmul.f32.gmra.mxu2 %v209_v30 }
  0xa4   : > { %537 = vmatmul.f32.gmra.mxu3 %v210_v31 }
  0xa5   : > { %342 = vmatmul.f32.gmra.mxu0 %v209_v30 }
  0xa7   : > { %407 = vmatmul.f32.gmra.mxu1 %v210_v31 }
  0xaa   : > { %v298_v34 = vpop.f32.mrf.mxu0 }
  0xab   : > { %v299_v35 = vadd.f32 %v298_v34, %v935_v33 }
  0xac   : > { %v363_v37 = vpop.f32.mrf.mxu1 }
  0xad   : > { %v364_v38 = vadd.f32 %v363_v37, %v299_v35 }
  0xae   : > { %v428_v39 = vpop.f32.mrf.mxu2 }
  0xaf   : > { %v493_v40 = vpop.f32.mrf.mxu3  ;;  %v429_v41 = vadd.f32 %v428_v39, %v938_v36  ;;  %541 = vst [vmem:[%s945_s27] sm:$0xff] %v364_v38 }
  0xb1   : > { %v494_v42 = vadd.f32 %v493_v40, %v429_v41 }
  0xb2   : > { %v301_v43 = vpop.f32.mrf.mxu0 }
  0xb3   : > { %542 = vst [vmem:[%s945_s27 + $0x8] sm:$0xff] %v494_v42  ;;  %v302_v44 = vadd.f32 %v301_v43, %v935_v33 }
  0xb4   : > { %v366_v45 = vpop.f32.mrf.mxu1 }
  0xb5   : > { %v367_v46 = vadd.f32 %v366_v45, %v302_v44 }
  0xb6   : > { %v431_v47 = vpop.f32.mrf.mxu2 }
  0xb7   : > { %v496_v48 = vpop.f32.mrf.mxu3  ;;  %v432_v49 = vadd.f32 %v431_v47, %v938_v36  ;;  %543 = vst [vmem:[%s945_s27 + $0x10] sm:$0xff] %v367_v46 }
  0xb9   : > { %v497_v50 = vadd.f32 %v496_v48, %v432_v49 }
  0xba   : > { %v304_v51 = vpop.f32.mrf.mxu0 }
  0xbb   : > { %544 = vst [vmem:[%s945_s27 + $0x18] sm:$0xff] %v497_v50  ;;  %v305_v52 = vadd.f32 %v304_v51, %v935_v33 }
  0xbc   : > { %v369_v53 = vpop.f32.mrf.mxu1 }
  0xbd   : > { %v370_v54 = vadd.f32 %v369_v53, %v305_v52 }
  0xbe   : > { %v434_v55 = vpop.f32.mrf.mxu2 }
  0xbf   : > { %v499_v56 = vpop.f32.mrf.mxu3  ;;  %v435_v57 = vadd.f32 %v434_v55, %v938_v36  ;;  %545 = vst [vmem:[%s945_s27 + $0x20] sm:$0xff] %v370_v54 }
  0xc1   : > { %v500_v58 = vadd.f32 %v499_v56, %v435_v57 }
  0xc2   : > { %v307_v59 = vpop.f32.mrf.mxu0 }
  0xc3   : > { %546 = vst [vmem:[%s945_s27 + $0x28] sm:$0xff] %v500_v58  ;;  %v308_v60 = vadd.f32 %v307_v59, %v935_v33 }
  0xc4   : > { %v372_v61 = vpop.f32.mrf.mxu1 }
  0xc5   : > { %v373_v62 = vadd.f32 %v372_v61, %v308_v60 }
  0xc6   : > { %v437_v63 = vpop.f32.mrf.mxu2 }
  0xc7   : > { %v502_v0 = vpop.f32.mrf.mxu3  ;;  %v438_v1 = vadd.f32 %v437_v63, %v938_v36  ;;  %547 = vst [vmem:[%s945_s27 + $0x30] sm:$0xff] %v373_v62 }
  0xc9   : > { %v503_v2 = vadd.f32 %v502_v0, %v438_v1 }
  0xca   : > { %v310_v3 = vpop.f32.mrf.mxu0 }
  0xcb   : > { %548 = vst [vmem:[%s945_s27 + $0x38] sm:$0xff] %v503_v2  ;;  %v311_v4 = vadd.f32 %v310_v3, %v935_v33 }
  0xcc   : > { %v375_v5 = vpop.f32.mrf.mxu1 }
  0xcd   : > { %v376_v6 = vadd.f32 %v375_v5, %v311_v4 }
  0xce   : > { %v440_v7 = vpop.f32.mrf.mxu2 }
  0xcf   : > { %v505_v8 = vpop.f32.mrf.mxu3  ;;  %v441_v9 = vadd.f32 %v440_v7, %v938_v36  ;;  %549 = vst [vmem:[%s945_s27 + $0x40] sm:$0xff] %v376_v6 }
  0xd1   : > { %v506_v10 = vadd.f32 %v505_v8, %v441_v9 }
  0xd2   : > { %v313_v11 = vpop.f32.mrf.mxu0 }
  0xd3   : > { %550 = vst [vmem:[%s945_s27 + $0x48] sm:$0xff] %v506_v10  ;;  %v314_v12 = vadd.f32 %v313_v11, %v935_v33 }
  0xd4   : > { %v378_v13 = vpop.f32.mrf.mxu1 }
  0xd5   : > { %v379_v14 = vadd.f32 %v378_v13, %v314_v12 }
  0xd6   : > { %v443_v15 = vpop.f32.mrf.mxu2 }
  0xd7   : > { %v508_v16 = vpop.f32.mrf.mxu3  ;;  %v444_v17 = vadd.f32 %v443_v15, %v938_v36  ;;  %551 = vst [vmem:[%s945_s27 + $0x50] sm:$0xff] %v379_v14 }
  0xd9   : > { %v509_v18 = vadd.f32 %v508_v16, %v444_v17 }
  0xda   : > { %v316_v19 = vpop.f32.mrf.mxu0 }
  0xdb   : > { %552 = vst [vmem:[%s945_s27 + $0x58] sm:$0xff] %v509_v18  ;;  %v317_v20 = vadd.f32 %v316_v19, %v935_v33 }
  0xdc   : > { %v381_v21 = vpop.f32.mrf.mxu1 }
  0xdd   : > { %v382_v22 = vadd.f32 %v381_v21, %v317_v20 }
  0xde   : > { %v446_v23 = vpop.f32.mrf.mxu2 }
  0xdf   : > { %v511_v24 = vpop.f32.mrf.mxu3  ;;  %v447_v25 = vadd.f32 %v446_v23, %v938_v36  ;;  %553 = vst [vmem:[%s945_s27 + $0x60] sm:$0xff] %v382_v22 }
  0xe1   : > { %v512_v26 = vadd.f32 %v511_v24, %v447_v25 }
  0xe2   : > { %v319_v27 = vpop.f32.mrf.mxu0 }
  0xe3   : > { %554 = vst [vmem:[%s945_s27 + $0x68] sm:$0xff] %v512_v26  ;;  %v320_v28 = vadd.f32 %v319_v27, %v935_v33 }
  0xe4   : > { %v384_v29 = vpop.f32.mrf.mxu1 }
  0xe5   : > { %v385_v30 = vadd.f32 %v384_v29, %v320_v28 }
  0xe6   : > { %v449_v31 = vpop.f32.mrf.mxu2 }
  0xe7   : > { %v514_v32 = vpop.f32.mrf.mxu3  ;;  %v450_v34 = vadd.f32 %v449_v31, %v938_v36  ;;  %555 = vst [vmem:[%s945_s27 + $0x70] sm:$0xff] %v385_v30 }
  0xe9   : > { %v515_v35 = vadd.f32 %v514_v32, %v450_v34 }
  0xea   : > { %v322_v37 = vpop.f32.mrf.mxu0 }
  0xeb   : > { %556 = vst [vmem:[%s945_s27 + $0x78] sm:$0xff] %v515_v35  ;;  %v323_v38 = vadd.f32 %v322_v37, %v935_v33 }
  0xec   : > { %v387_v39 = vpop.f32.mrf.mxu1 }
  0xed   : > { %v388_v40 = vadd.f32 %v387_v39, %v323_v38 }
  0xee   : > { %v452_v41 = vpop.f32.mrf.mxu2 }
  0xef   : > { %v517_v42 = vpop.f32.mrf.mxu3  ;;  %v453_v43 = vadd.f32 %v452_v41, %v938_v36  ;;  %557 = vst [vmem:[%s945_s27 + $0x80] sm:$0xff] %v388_v40 }
  0xf1   : > { %v518_v44 = vadd.f32 %v517_v42, %v453_v43 }
  0xf2   : > { %v325_v45 = vpop.f32.mrf.mxu0 }
  0xf3   : > { %558 = vst [vmem:[%s945_s27 + $0x88] sm:$0xff] %v518_v44  ;;  %v326_v46 = vadd.f32 %v325_v45, %v935_v33 }
  0xf4   : > { %v390_v47 = vpop.f32.mrf.mxu1 }
  0xf5   : > { %v391_v48 = vadd.f32 %v390_v47, %v326_v46 }
  0xf6   : > { %v455_v49 = vpop.f32.mrf.mxu2 }
  0xf7   : > { %v520_v50 = vpop.f32.mrf.mxu3  ;;  %v456_v51 = vadd.f32 %v455_v49, %v938_v36  ;;  %559 = vst [vmem:[%s945_s27 + $0x90] sm:$0xff] %v391_v48 }
  0xf9   : > { %v521_v52 = vadd.f32 %v520_v50, %v456_v51 }
  0xfa   : > { %v328_v53 = vpop.f32.mrf.mxu0 }
  0xfb   : > { %560 = vst [vmem:[%s945_s27 + $0x98] sm:$0xff] %v521_v52  ;;  %v329_v54 = vadd.f32 %v328_v53, %v935_v33 }
  0xfc   : > { %v393_v55 = vpop.f32.mrf.mxu1 }
  0xfd   : > { %v394_v56 = vadd.f32 %v393_v55, %v329_v54 }
  0xfe   : > { %v458_v57 = vpop.f32.mrf.mxu2 }
  0xff   : > { %v523_v58 = vpop.f32.mrf.mxu3  ;;  %v459_v59 = vadd.f32 %v458_v57, %v938_v36  ;;  %561 = vst [vmem:[%s945_s27 + $0xa0] sm:$0xff] %v394_v56 }
 0x101   : > { %v524_v60 = vadd.f32 %v523_v58, %v459_v59 }
 0x102   : > { %v331_v61 = vpop.f32.mrf.mxu0 }
 0x103   : > { %562 = vst [vmem:[%s945_s27 + $0xa8] sm:$0xff] %v524_v60  ;;  %v332_v62 = vadd.f32 %v331_v61, %v935_v33 }
 0x104   : > { %v396_v63 = vpop.f32.mrf.mxu1 }
 0x105   : > { %v397_v0 = vadd.f32 %v396_v63, %v332_v62 }
 0x106   : > { %v461_v1 = vpop.f32.mrf.mxu2 }
 0x107   : > { %v526_v2 = vpop.f32.mrf.mxu3  ;;  %v462_v3 = vadd.f32 %v461_v1, %v938_v36  ;;  %563 = vst [vmem:[%s945_s27 + $0xb0] sm:$0xff] %v397_v0 }
 0x109   : > { %v527_v4 = vadd.f32 %v526_v2, %v462_v3 }
 0x10a   : > { %v334_v5 = vpop.f32.mrf.mxu0 }
 0x10b   : > { %564 = vst [vmem:[%s945_s27 + $0xb8] sm:$0xff] %v527_v4  ;;  %v335_v6 = vadd.f32 %v334_v5, %v935_v33 }
 0x10c   : > { %v399_v7 = vpop.f32.mrf.mxu1 }
 0x10d   : > { %v400_v8 = vadd.f32 %v399_v7, %v335_v6 }
 0x10e   : > { %v464_v9 = vpop.f32.mrf.mxu2 }
 0x10f   : > { %v529_v10 = vpop.f32.mrf.mxu3  ;;  %v465_v11 = vadd.f32 %v464_v9, %v938_v36  ;;  %565 = vst [vmem:[%s945_s27 + $0xc0] sm:$0xff] %v400_v8 }
 0x111   : > { %v530_v12 = vadd.f32 %v529_v10, %v465_v11 }
 0x112   : > { %v337_v13 = vpop.f32.mrf.mxu0 }
 0x113   : > { %566 = vst [vmem:[%s945_s27 + $0xc8] sm:$0xff] %v530_v12  ;;  %v338_v14 = vadd.f32 %v337_v13, %v935_v33 }
 0x114   : > { %v402_v15 = vpop.f32.mrf.mxu1 }
 0x115   : > { %v403_v16 = vadd.f32 %v402_v15, %v338_v14 }
 0x116   : > { %v467_v17 = vpop.f32.mrf.mxu2 }
 0x117   : > { %v532_v18 = vpop.f32.mrf.mxu3  ;;  %v468_v19 = vadd.f32 %v467_v17, %v938_v36  ;;  %567 = vst [vmem:[%s945_s27 + $0xd0] sm:$0xff] %v403_v16 }
 0x119   : > { %v533_v20 = vadd.f32 %v532_v18, %v468_v19 }
 0x11a   : > { %v340_v21 = vpop.f32.mrf.mxu0 }
 0x11b   : > { %568 = vst [vmem:[%s945_s27 + $0xd8] sm:$0xff] %v533_v20  ;;  %v341_v22 = vadd.f32 %v340_v21, %v935_v33 }
 0x11c   : > { %v405_v23 = vpop.f32.mrf.mxu1 }
 0x11d   : > { %v406_v24 = vadd.f32 %v405_v23, %v341_v22 }
 0x11e   : > { %v470_v25 = vpop.f32.mrf.mxu2 }
 0x11f   : > { %v535_v26 = vpop.f32.mrf.mxu3  ;;  %v471_v27 = vadd.f32 %v470_v25, %v938_v36  ;;  %569 = vst [vmem:[%s945_s27 + $0xe0] sm:$0xff] %v406_v24 }
 0x121   : > { %v536_v28 = vadd.f32 %v535_v26, %v471_v27 }
 0x122   : > { %v343_v29 = vpop.f32.mrf.mxu0 }
 0x123   : > { %570 = vst [vmem:[%s945_s27 + $0xe8] sm:$0xff] %v536_v28  ;;  %v344_v30 = vadd.f32 %v343_v29, %v935_v33 }
 0x124   : > { %v408_v31 = vpop.f32.mrf.mxu1 }
 0x125   : > { %v409_v32 = vadd.f32 %v408_v31, %v344_v30 }
 0x126   : > { %v473_v34 = vpop.f32.mrf.mxu2 }
 0x127   : > { %v538_v35 = vpop.f32.mrf.mxu3  ;;  %v474_v37 = vadd.f32 %v473_v34, %v938_v36  ;;  %571 = vst [vmem:[%s945_s27 + $0xf0] sm:$0xff] %v409_v32 }
 0x129   : > { %v539_v38 = vadd.f32 %v538_v35, %v474_v37 }
 0x12b   : > { %572 = vst [vmem:[%s945_s27 + $0xf8] sm:$0xff] %v539_v38 }
 0x12c PF: > { %s13_s12 = sadd.s32 1, %s660_s12  }
 0x12d   : > { %p10_p4 = scmp.ge.s32.totalorder %s13_s12, 4  }
 0x12f   :  { %12 = sbr.rel (!%p10_p4) target bundleno = 1 (0x1), region = 62 }

</bundles_post_ra>
